<compile_context>
chip_gen: v6e
topology: v6e:2x2x1
jax: 0.10.0
libtpu: 0.0.40
codegen_flags: <defaults>
</compile_context>

<pallas_src>
import functools
import math

import numpy as np
import jax
import jax.numpy as jnp
from jax import lax
from jax.experimental import pallas as pl
from jax.experimental.pallas import tpu as pltpu


# ---------------------------------------------------------------------------
# Kernel 1: conv1 = Conv2d(1, odim, 3, stride=2) + ReLU as ONE MXU matmul over
# im2col rows:  (tm, 9) @ (9, odim) + bias + ReLU.
# Row order is (b, packed_freq, packed_time) so the output reshapes (view only)
# into exactly the h1 layout kernel 2 consumes.
# ---------------------------------------------------------------------------
def _conv1_kernel(p_ref, w_ref, b_ref, o_ref):
    acc = jnp.dot(p_ref[...], w_ref[...], preferred_element_type=jnp.float32)
    o_ref[...] = jnp.maximum(acc + b_ref[...], 0.0).astype(o_ref.dtype)


def conv1_relu(p1_flat, w1_mat, b1, *, odim, row_tile=512):
    """p1_flat: (M, 9) -> (M, odim)."""
    M = p1_flat.shape[0]
    tm = M if M <= row_tile else row_tile        # M is always a multiple of 8
    return pl.pallas_call(
        _conv1_kernel,
        out_shape=jax.ShapeDtypeStruct((M, odim), jnp.float32),
        grid=(pl.cdiv(M, tm),),
        in_specs=[
            pl.BlockSpec((tm, 9), lambda i: (i, 0)),
            pl.BlockSpec((9, odim), lambda i: (0, 0)),
            pl.BlockSpec((1, odim), lambda i: (0, 0)),
        ],
        out_specs=pl.BlockSpec((tm, odim), lambda i: (i, 0)),
        compiler_params=pltpu.CompilerParams(
            dimension_semantics=("parallel",)),
    )(p1_flat, w1_mat, b1.reshape(1, odim))


# ---------------------------------------------------------------------------
# Kernel 2: conv2 (implicit im2col) + ReLU + Linear + sqrt(odim) scale, fused.
# One grid step = one (batch, Tt-frame tile):
#   em_ref : (1, F1, Tt, odim)  even-time h1 rows  [Tt*t, Tt*(t+1))
#   ex_ref : (1, F1, 8,  odim)  even-time h1 rows  [Tt*(t+1), Tt*(t+1)+8)
#   om_ref : (1, F1, Tt, odim)  odd-time  h1 rows  [Tt*t, Tt*(t+1))
#   w2_ref : (9, odim, odim)    conv2 tap weights [kt*3+kf, cin, cout] (resident)
#   wl_ref : (F2, odim, odim)   out-Linear weights, f-major (resident)
#   o_ref  : (1, Tt, odim)      dense output slab
# ---------------------------------------------------------------------------
def _conv2_linear_kernel(em_ref, ex_ref, om_ref, w2_ref, b2_ref, wl_ref,
                         bl_ref, o_ref, *, Tt, F2, F1e, scale):
    odim = o_ref.shape[-1]
    em = em_ref[0]                                      # (F1, Tt, odim)
    eall = jnp.concatenate([em, ex_ref[0]], axis=1)     # (F1, Tt + 8, odim)
    planes = (em,                                       # kt = 0: even rows t
              om_ref[0],                                # kt = 1: odd  rows t
              eall[:, 1:Tt + 1, :])                     # kt = 2: even rows t+1

    # 9 accumulating MXU matmuls with M = F2*Tt, K = N = odim.
    acc = jnp.zeros((F2 * Tt, odim), jnp.float32)
    for kt in range(3):
        for kf in range(3):
            # packed-frequency offset: kf=0 -> 0, kf=1 -> F1e, kf=2 -> 1
            fstart = (kf % 2) * F1e + kf // 2
            lhs = planes[kt][fstart:fstart + F2]        # (F2, Tt, odim)
            lhs = lhs.reshape(F2 * Tt, odim)            # Tt % 8 == 0 -> aligned
            acc = acc + jnp.dot(lhs, w2_ref[kt * 3 + kf],
                                preferred_element_type=jnp.float32)
    h2 = jnp.maximum(acc + b2_ref[...], 0.0)            # (F2*Tt, odim), f-major

    # out Linear batched over the Tt frames (M = Tt per frequency).
    y = jnp.zeros((Tt, odim), jnp.float32)
    for f in range(F2):
        y = y + jnp.dot(h2[f * Tt:(f + 1) * Tt, :], wl_ref[f],
                        preferred_element_type=jnp.float32)
    o_ref[0] = ((y + bl_ref[...]) * scale).astype(o_ref.dtype)


def conv2_linear(h1, w2_taps, b2, wl_taps, bl, *, Tt, n_t, F1e, F2, odim,
                 scale):
    """h1: (B, F1, Tp, odim) packed layout -> y: (B, n_t*Tt, odim)."""
    B, F1, _, _ = h1.shape
    T2pad = n_t * Tt
    kernel = functools.partial(_conv2_linear_kernel, Tt=Tt, F2=F2, F1e=F1e,
                               scale=scale)
    return pl.pallas_call(
        kernel,
        out_shape=jax.ShapeDtypeStruct((B, T2pad, odim), jnp.float32),
        grid=(B, n_t),
        in_specs=[
            # even-time rows [Tt*t, Tt*(t+1))
            pl.BlockSpec((1, F1, Tt, odim), lambda b, t: (b, 0, t, 0)),
            # even-time rows [Tt*(t+1), Tt*(t+1)+8)  (only row 0 is used)
            pl.BlockSpec((1, F1, 8, odim),
                         lambda b, t: (b, 0, (Tt // 8) * (t + 1), 0)),
            # odd-time rows [Tt*t, Tt*(t+1)) ; odd plane starts at (n_t+1)*Tt
            pl.BlockSpec((1, F1, Tt, odim),
                         lambda b, t: (b, 0, n_t + 1 + t, 0)),
            pl.BlockSpec((9, odim, odim), lambda b, t: (0, 0, 0)),
            pl.BlockSpec((1, odim), lambda b, t: (0, 0)),
            pl.BlockSpec((F2, odim, odim), lambda b, t: (0, 0, 0)),
            pl.BlockSpec((1, odim), lambda b, t: (0, 0)),
        ],
        out_specs=pl.BlockSpec((1, Tt, odim), lambda b, t: (b, t, 0)),
        compiler_params=pltpu.CompilerParams(
            dimension_semantics=("parallel", "parallel")),
    )(h1, h1, h1, w2_taps, b2.reshape(1, odim), wl_taps, bl.reshape(1, odim))


# ---------------------------------------------------------------------------
# Conv2dSubsampling4 forward.
# ---------------------------------------------------------------------------
def conv2d_subsampling4_forward(x, x_mask, params, odim, offset=0,
                                time_tile=8):
    """x: (B, T, idim) float32, x_mask: (B, 1, T) bool."""
    B, T, idim = x.shape
    T1 = (T - 1) // 2
    F1 = (idim - 1) // 2
    T2 = (T1 - 1) // 2
    F2 = (F1 - 1) // 2
    F1e = (F1 + 1) // 2                      # even-frequency plane size
    T1e = (T1 + 1) // 2                      # even-time rows of h1
    T1o = T1 // 2                            # odd-time rows of h1

    Tt = time_tile
    assert Tt % 8 == 0, "time_tile must be a multiple of 8"
    n_t = max(1, -(-T2 // Tt))               # ceil(T2 / Tt)
    T1e_pad = (n_t + 1) * Tt                 # padded even-time plane
    T1o_pad = n_t * Tt                       # padded odd-time plane
    Tp = T1e_pad + T1o_pad

    # ---- conv1 im2col taps, parity-packed (time & freq) + padded ----------
    cols = [x[:, kt:kt + 2 * T1:2, kf:kf + 2 * F1:2]
            for kt in range(3) for kf in range(3)]
    p = jnp.stack(cols, axis=-1)                          # (B, T1, F1, 9)
    p = jnp.pad(p, ((0, 0), (0, 1), (0, 0), (0, 0)))      # zero row for padding
    t_idx = np.full((Tp,), T1, dtype=np.int32)            # default -> zero row
    t_idx[:T1e] = np.arange(0, 2 * T1e, 2)
    n_odd = min(T1o, T1o_pad)
    t_idx[T1e_pad:T1e_pad + n_odd] = np.arange(1, 2 * n_odd, 2)
    f_idx = np.concatenate([np.arange(0, F1, 2),
                            np.arange(1, F1, 2)]).astype(np.int32)
    p = jnp.take(p, jnp.asarray(t_idx), axis=1)           # (B, Tp, F1, 9)
    p = jnp.take(p, jnp.asarray(f_idx), axis=2)
    p1 = jnp.transpose(p, (0, 2, 1, 3)).reshape(B * F1 * Tp, 9)

    # ---- conv1 (+ReLU) on the MXU ------------------------------------------
    # PyTorch w1: (odim, 1, 3, 3) -> (9, odim), row k = kt*3 + kf
    w1_mat = params["w1"].reshape(odim, 9).T
    h1 = conv1_relu(p1, w1_mat, params["b1"], odim=odim)
    h1 = h1.reshape(B, F1, Tp, odim)                      # view-only reshape

    # ---- conv2 + ReLU + Linear + pos-enc scale (fused Pallas kernel) -------
    # PyTorch w2: (odim, odim, 3, 3) OIHW -> (9, cin, cout), tap = kt*3 + kf
    w2_taps = jnp.transpose(params["w2"], (2, 3, 1, 0)).reshape(9, odim, odim)
    # w_lin rows ordered c*F2+f (matches transpose(1,2).view(b,t,c*f));
    # pre-permute once to f-major (F2, cin, out) so h2 stays f-major in-kernel.
    wl_taps = jnp.transpose(params["w_lin"].reshape(odim, F2, odim), (1, 0, 2))
    y = conv2_linear(h1, w2_taps, params["b2"], wl_taps, params["b_lin"],
                     Tt=Tt, n_t=n_t, F1e=F1e, F2=F2, odim=odim,
                     scale=math.sqrt(odim))
    y = y[:, :T2, :]

    # ---- positional encoding table (RelPositionalEncoding): glue ----------
    pos = jnp.arange(offset, offset + T2, dtype=jnp.float32)[:, None]
    div = jnp.exp(jnp.arange(0, odim, 2, dtype=jnp.float32)
                  * (-math.log(10000.0) / odim))
    pe = jnp.zeros((T2, odim), jnp.float32)
    pe = pe.at[:, 0::2].set(jnp.sin(pos * div))
    pe = pe.at[:, 1::2].set(jnp.cos(pos * div))
    pos_emb = pe[None]                                    # (1, T2, odim)
    # TODO(synk): dropout omitted (eval mode / identity).

    # ---- mask subsampling: x_mask[:, :, :-2:2][:, :, :-2:2] ----------------
    mask_sub = x_mask[:, :, :-2:2][:, :, :-2:2]
    return y, pos_emb, mask_sub


# ---------------------------------------------------------------------------
# Pure-JAX reference (lax.conv) to validate the Pallas path.
# ---------------------------------------------------------------------------
def reference_forward(x, params, odim):
    xi = x[:, None, :, :]  # NCHW
    h = lax.conv_general_dilated(xi, params["w1"], (2, 2), "VALID",
                                 dimension_numbers=("NCHW", "OIHW", "NCHW"))
    h = jax.nn.relu(h + params["b1"][None, :, None, None])
    h = lax.conv_general_dilated(h, params["w2"], (2, 2), "VALID",
                                 dimension_numbers=("NCHW", "OIHW", "NCHW"))
    h = jax.nn.relu(h + params["b2"][None, :, None, None])
    b, c, t, f = h.shape
    h = jnp.transpose(h, (0, 2, 1, 3)).reshape(b, t, c * f)
    y = h @ params["w_lin"] + params["b_lin"]
    return y * math.sqrt(odim)


if __name__ == "__main__":
    B, T, idim, odim = 2, 16, 16, 32

    key = jax.random.PRNGKey(0)
    ks = jax.random.split(key, 8)
    F2 = ((idim - 1) // 2 - 1) // 2  # = 3

    # NOTE: w_lin is stored as (in_features, out_features) = PyTorch weight.T
    params = {
        "w1": jax.random.normal(ks[0], (odim, 1, 3, 3), jnp.float32) * 0.1,
        "b1": jax.random.normal(ks[1], (odim,), jnp.float32) * 0.1,
        "w2": jax.random.normal(ks[2], (odim, odim, 3, 3), jnp.float32) * 0.05,
        "b2": jax.random.normal(ks[3], (odim,), jnp.float32) * 0.1,
        "w_lin": jax.random.normal(ks[4], (odim * F2, odim), jnp.float32) * 0.05,
        "b_lin": jax.random.normal(ks[5], (odim,), jnp.float32) * 0.1,
    }

    x = jax.random.normal(ks[6], (B, T, idim), jnp.float32)
    x_mask = jnp.ones((B, 1, T), dtype=bool)

    y, pos_emb, mask_sub = conv2d_subsampling4_forward(x, x_mask, params, odim)
    jax.block_until_ready((y, pos_emb, mask_sub))

    # sanity vs pure-JAX reference
    y_ref = reference_forward(x, params, odim)
    assert y.shape == y_ref.shape == (B, 3, odim), (y.shape, y_ref.shape)
    assert pos_emb.shape == (1, y.shape[1], odim)
    assert mask_sub.shape == (B, 1, y.shape[1])
    assert jnp.allclose(y, y_ref, atol=1e-3, rtol=1e-3), \
        "mismatch vs reference (max abs err %e)" % float(jnp.max(jnp.abs(y - y_ref)))

    print("KERNEL_OK")
</pallas_src>

<mosaic_0001>
module attributes {stable_mosaic.version = 11 : i64} {
  func.func @_conv1_kernel(%arg0: i32, %arg1: memref<336x9xf32, #tpu.memory_space<vmem>>, %arg2: memref<9x32xf32, #tpu.memory_space<vmem>>, %arg3: memref<1x32xf32, #tpu.memory_space<vmem>>, %arg4: memref<336x32xf32, #tpu.memory_space<vmem>>) attributes {dimension_semantics = [#tpu.dimension_semantics<parallel>], iteration_bounds = array<i64: 1>, scalar_prefetch = 0 : i64, scratch_operands = 0 : i64, tpu.core_type = #tpu.core_type<tc>, window_params = [{transform_indices = @transform_0, window_bounds = array<i64: 336, 9>}, {pipeline_mode = #tpu.pipeline_mode<synchronous>, transform_indices = @transform_1, window_bounds = array<i64: 9, 32>}, {pipeline_mode = #tpu.pipeline_mode<synchronous>, transform_indices = @transform_2, window_bounds = array<i64: 1, 32>}, {transform_indices = @transform_3, window_bounds = array<i64: 336, 32>}]} {
    %c0 = arith.constant 0 : index
    %c0_0 = arith.constant 0 : index
    %0 = vector.load %arg1[%c0, %c0_0] : memref<336x9xf32, #tpu.memory_space<vmem>>, vector<336x9xf32>
    %c0_1 = arith.constant 0 : index
    %c0_2 = arith.constant 0 : index
    %1 = vector.load %arg2[%c0_1, %c0_2] : memref<9x32xf32, #tpu.memory_space<vmem>>, vector<9x32xf32>
    %cst = arith.constant dense<0.000000e+00> : vector<336x32xf32>
    %2 = tpu.matmul %0, %1, %cst {dimension_numbers = #tpu.dot_dimension_numbers<[1], [0], [0], [1], [0, 0, 1, 1], [], []>} : vector<336x9xf32>, vector<9x32xf32>, vector<336x32xf32> -> vector<336x32xf32>
    %c0_3 = arith.constant 0 : index
    %c0_4 = arith.constant 0 : index
    %3 = vector.load %arg3[%c0_3, %c0_4] : memref<1x32xf32, #tpu.memory_space<vmem>>, vector<1x32xf32>
    %4 = vector.broadcast %3 : vector<1x32xf32> to vector<336x32xf32>
    %5 = arith.addf %2, %4 : vector<336x32xf32>
    %cst_5 = arith.constant 0.000000e+00 : f32
    %6 = vector.broadcast %cst_5 : f32 to vector<336x32xf32>
    %7 = arith.maximumf %5, %6 : vector<336x32xf32>
    %c0_6 = arith.constant 0 : index
    %c0_7 = arith.constant 0 : index
    %8 = vector.load %arg4[%c0_6, %c0_7] : memref<336x32xf32, #tpu.memory_space<vmem>>, vector<336x32xf32>
    tpu.vector_store %arg4[%c0_6, %c0_7], %7 {strides = array<i32>} : memref<336x32xf32, #tpu.memory_space<vmem>>, vector<336x32xf32>,
    return
  }
  func.func @transform_0(%arg0: i32) -> (i32, i32) {
    %c0_i32 = arith.constant 0 : i32
    %c0_i32_0 = arith.constant 0 : i32
    return %arg0, %c0_i32 : i32, i32
  }
  func.func @transform_1(%arg0: i32) -> (i32, i32) {
    %c0_i32 = arith.constant 0 : i32
    %c0_i32_0 = arith.constant 0 : i32
    %c0_i32_1 = arith.constant 0 : i32
    return %c0_i32, %c0_i32_0 : i32, i32
  }
  func.func @transform_2(%arg0: i32) -> (i32, i32) {
    %c0_i32 = arith.constant 0 : i32
    %c0_i32_0 = arith.constant 0 : i32
    %c0_i32_1 = arith.constant 0 : i32
    return %c0_i32, %c0_i32_0 : i32, i32
  }
  func.func @transform_3(%arg0: i32) -> (i32, i32) {
    %c0_i32 = arith.constant 0 : i32
    %c0_i32_0 = arith.constant 0 : i32
    return %arg0, %c0_i32 : i32, i32
  }
}

</mosaic_0001>

<bundles_post_ra>
// kernel: tpu_custom_call.1
= control target key start
LH: loop header
LB: loop body
LE: loop exit
PB: predicated region body
PF: predicated region fallthrough
CT: control target
= control target key end

     0   :  { %vm192_vm0 = vcmask 1040384   ;;  %vm65_vm1 = vcmask 72704   ;;  %vm513_vm2 = vcmask 261120   ;;  %s1128_s1 = inlined_call_operand.vmem [shape: f32[9,32], index: 1, kind: input, shape index: {}]   ;;  %s1129_s0 = inlined_call_operand.vmem [shape: f32[336,9], index: 0, kind: input, shape index: {}]   ;;  %s1130_s2 = inlined_call_operand.vmem [shape: f32[1,32], index: 2, kind: input, shape index: {}]   ;;  %s1131_s3 = inlined_call_operand.vmem [shape: f32[336,32], index: 3, kind: output, shape index: {}]  }
   0x1   :  { %v57_v0 = vld [vmem:[%s1128_s1 + $0x8] sm:$0x1]  ;;  %v56_v1 = vld [vmem:[%s1128_s1] sm:$0xff]  ;;  %v36_v4 = vld [vmem:[%s1129_s0 + $0xb0] sm:$0xff] }
   0x2   :  { %v14_v2 = vld [vmem:[%s1129_s0] sm:$0xff]  ;;  %648 = vmatprep.subr.msk.mxu0 %vm192_vm0, %v57_v0  ;;  %715 = vmatprep.subr.msk.mxu1 %vm192_vm0, %v57_v0  ;;  %v15_v3 = vld [vmem:[%s1129_s0 + $0x8] sm:$0xff]  ;;  %v16_v5 = vld [vmem:[%s1129_s0 + $0x10] sm:$0xff] }
   0x3   :  { %649 = vmatpush3.msk.msra.mxu0 %vm192_vm0, %v57_v0  ;;  %717 = vmatpush3.msk.msra.mxu1 %vm192_vm0, %v57_v0  ;;  %v37_v6 = vld [vmem:[%s1129_s0 + $0xb8] sm:$0xff]  ;;  %v38_v7 = vld [vmem:[%s1129_s0 + $0xc0] sm:$0xff]  ;;  %v39_v10 = vld [vmem:[%s1129_s0 + $0xc8] sm:$0xff] }
   0x4   :  { %650 = vmatprep.subr.mxu0 %v56_v1  ;;  %652 = vmatprep.mubr.msk.f32.mxu0 %vm65_vm1, %v14_v2  ;;  %v17_v8 = vld [vmem:[%s1129_s0 + $0x18] sm:$0xff]  ;;  %v18_v9 = vld [vmem:[%s1129_s0 + $0x20] sm:$0xff]  ;;  %v40_v11 = vld [vmem:[%s1129_s0 + $0xd0] sm:$0xff] }
   0x5   :  { %651 = vmatpush3.msra.mxu0 %v56_v1  ;;  %716 = vmatprep.subr.mxu1 %v56_v1  ;;  %v19_v12 = vld [vmem:[%s1129_s0 + $0x28] sm:$0xff]  ;;  %v20_v13 = vld [vmem:[%s1129_s0 + $0x30] sm:$0xff]  ;;  %v41_v14 = vld [vmem:[%s1129_s0 + $0xd8] sm:$0xff] }
   0x6   :  { %653 = vmatmul.mubr.msk.f32.vlgmr.msra.gmra.mxu0 %vm65_vm1, %v15_v3  ;;  %718 = vmatpush3.msra.mxu1 %v56_v1  ;;  %v42_v15 = vld [vmem:[%s1129_s0 + $0xe0] sm:$0xff]  ;;  %v21_v16 = vld [vmem:[%s1129_s0 + $0x38] sm:$0xff]  ;;  %v43_v18 = vld [vmem:[%s1129_s0 + $0xe8] sm:$0xff] }
   0x7   :  { %685 = vmatprep.mubr.msk.f32.mxu1 %vm65_vm1, %v36_v4  ;;  %655 = vmatprep.mubr.msk.f32.mxu0 %vm65_vm1, %v16_v5  ;;  %v22_v17 = vld [vmem:[%s1129_s0 + $0x40] sm:$0xff]  ;;  %v44_v19 = vld [vmem:[%s1129_s0 + $0xf0] sm:$0xff]  ;;  %v23_v20 = vld [vmem:[%s1129_s0 + $0x48] sm:$0xff] }
   0x8   :  { %686 = vmatmul.mubr.msk.f32.vlgmr.msra.gmra.mxu1 %vm65_vm1, %v37_v6  ;;  %v24_v21 = vld [vmem:[%s1129_s0 + $0x50] sm:$0xff]  ;;  %v45_v22 = vld [vmem:[%s1129_s0 + $0xf8] sm:$0xff]  ;;  %v46_v23 = vld [vmem:[%s1129_s0 + $0x100] sm:$0xff] }
   0x9   :  { %688 = vmatprep.mubr.msk.f32.mxu1 %vm65_vm1, %v38_v7  ;;  %v25_v24 = vld [vmem:[%s1129_s0 + $0x58] sm:$0xff]  ;;  %v26_v25 = vld [vmem:[%s1129_s0 + $0x60] sm:$0xff]  ;;  %v47_v26 = vld [vmem:[%s1129_s0 + $0x108] sm:$0xff] }
   0xa   :  { %656 = vmatmul.mubr.msk.f32.gmra.mxu0 %vm65_vm1, %v17_v8  ;;  %v48_v27 = vld [vmem:[%s1129_s0 + $0x110] sm:$0xff]  ;;  %v27_v28 = vld [vmem:[%s1129_s0 + $0x68] sm:$0xff]  ;;  %v49_v30 = vld [vmem:[%s1129_s0 + $0x118] sm:$0xff] }
   0xb   :  { %658 = vmatprep.mubr.msk.f32.mxu0 %vm65_vm1, %v18_v9  ;;  %v28_v29 = vld [vmem:[%s1129_s0 + $0x70] sm:$0xff]  ;;  %v50_v31 = vld [vmem:[%s1129_s0 + $0x120] sm:$0xff]  ;;  %v29_v32 = vld [vmem:[%s1129_s0 + $0x78] sm:$0xff] }
   0xc   :  { %689 = vmatmul.mubr.msk.f32.gmra.mxu1 %vm65_vm1, %v39_v10  ;;  %v30_v33 = vld [vmem:[%s1129_s0 + $0x80] sm:$0xff]  ;;  %v51_v34 = vld [vmem:[%s1129_s0 + $0x128] sm:$0xff]  ;;  %v52_v35 = vld [vmem:[%s1129_s0 + $0x130] sm:$0xff] }
   0xd   :  { %691 = vmatprep.mubr.msk.f32.mxu1 %vm65_vm1, %v40_v11  ;;  %v31_v36 = vld [vmem:[%s1129_s0 + $0x88] sm:$0xff]  ;;  %v32_v37 = vld [vmem:[%s1129_s0 + $0x90] sm:$0xff]  ;;  %v53_v38 = vld [vmem:[%s1129_s0 + $0x138] sm:$0xff] }
   0xe   :  { %659 = vmatmul.mubr.msk.f32.gmra.mxu0 %vm65_vm1, %v19_v12  ;;  %v54_v39 = vld [vmem:[%s1129_s0 + $0x140] sm:$0xff]  ;;  %v33_v40 = vld [vmem:[%s1129_s0 + $0x98] sm:$0xff]  ;;  %v55_v42 = vld [vmem:[%s1129_s0 + $0x148] sm:$0xff] }
   0xf   :  { %661 = vmatprep.mubr.msk.f32.mxu0 %vm65_vm1, %v20_v13  ;;  %v34_v41 = vld [vmem:[%s1129_s0 + $0xa0] sm:$0xff]  ;;  %v35_v43 = vld [vmem:[%s1129_s0 + $0xa8] sm:$0xff] }
  0x10   :  { %692 = vmatmul.mubr.msk.f32.gmra.mxu1 %vm65_vm1, %v41_v14  ;;  %v916_v44 = vld [vmem:[%s1130_s2] ss:$0 sm:$0xff] }
  0x11   :  { %694 = vmatprep.mubr.msk.f32.mxu1 %vm65_vm1, %v42_v15 }
  0x12   :  { %662 = vmatmul.mubr.msk.f32.gmra.mxu0 %vm65_vm1, %v21_v16 }
  0x13   :  { %664 = vmatprep.mubr.msk.f32.mxu0 %vm65_vm1, %v22_v17 }
  0x14   :  { %695 = vmatmul.mubr.msk.f32.gmra.mxu1 %vm65_vm1, %v43_v18 }
  0x15   :  { %697 = vmatprep.mubr.msk.f32.mxu1 %vm65_vm1, %v44_v19 }
  0x16   :  { %665 = vmatmul.mubr.msk.f32.gmra.mxu0 %vm65_vm1, %v23_v20 }
  0x17   :  { %667 = vmatprep.mubr.msk.f32.mxu0 %vm65_vm1, %v24_v21 }
  0x18   :  { %698 = vmatmul.mubr.msk.f32.gmra.mxu1 %vm65_vm1, %v45_v22 }
  0x19   :  { %700 = vmatprep.mubr.msk.f32.mxu1 %vm65_vm1, %v46_v23 }
  0x1a   :  { %668 = vmatmul.mubr.msk.f32.gmra.mxu0 %vm65_vm1, %v25_v24 }
  0x1b   :  { %670 = vmatprep.mubr.msk.f32.mxu0 %vm65_vm1, %v26_v25 }
  0x1c   :  { %701 = vmatmul.mubr.msk.f32.gmra.mxu1 %vm65_vm1, %v47_v26 }
  0x1d   :  { %703 = vmatprep.mubr.msk.f32.mxu1 %vm65_vm1, %v48_v27 }
  0x1e   :  { %671 = vmatmul.mubr.msk.f32.gmra.mxu0 %vm65_vm1, %v27_v28 }
  0x1f   :  { %673 = vmatprep.mubr.msk.f32.mxu0 %vm65_vm1, %v28_v29 }
  0x20   :  { %704 = vmatmul.mubr.msk.f32.gmra.mxu1 %vm65_vm1, %v49_v30 }
  0x21   :  { %706 = vmatprep.mubr.msk.f32.mxu1 %vm65_vm1, %v50_v31 }
  0x22   :  { %674 = vmatmul.mubr.msk.f32.gmra.mxu0 %vm65_vm1, %v29_v32 }
  0x23   :  { %676 = vmatprep.mubr.msk.f32.mxu0 %vm65_vm1, %v30_v33 }
  0x24   :  { %707 = vmatmul.mubr.msk.f32.gmra.mxu1 %vm65_vm1, %v51_v34 }
  0x25   :  { %709 = vmatprep.mubr.msk.f32.mxu1 %vm65_vm1, %v52_v35 }
  0x26   :  { %677 = vmatmul.mubr.msk.f32.gmra.mxu0 %vm65_vm1, %v31_v36 }
  0x27   :  { %679 = vmatprep.mubr.msk.f32.mxu0 %vm65_vm1, %v32_v37 }
  0x28   :  { %710 = vmatmul.mubr.msk.f32.gmra.mxu1 %vm65_vm1, %v53_v38 }
  0x29   :  { %712 = vmatprep.mubr.msk.f32.mxu1 %vm65_vm1, %v54_v39 }
  0x2a   :  { %680 = vmatmul.mubr.msk.f32.gmra.mxu0 %vm65_vm1, %v33_v40 }
  0x2b   :  { %682 = vmatprep.mubr.msk.f32.mxu0 %vm65_vm1, %v34_v41 }
  0x2c   :  { %713 = vmatmul.mubr.msk.f32.gmra.mxu1 %vm65_vm1, %v55_v42 }
  0x2e   :  { %683 = vmatmul.mubr.msk.f32.gmra.mxu0 %vm65_vm1, %v35_v43 }
  0xc6   :  { %v654_v45 = vpop.f32.mrf.mxu0 }
  0xc7   :  { %v268_v46 = vadd.f32 %v654_v45, %v916_v44 }
  0xc8   :  { %v262_v47 = vpop.f32.mrf.mxu0  ;;  %v687_v48 = vpop.f32.mrf.mxu1 }
  0xc9   :  { %v472_v49 = vmax.f32 %v268_v46, 0.0  ;;  %v263_v50 = vadd.f32 %v916_v44, %v262_v47  ;;  %v378_v51 = vadd.f32 %v687_v48, %v916_v44 }
  0xca   :  { %v657_v52 = vpop.f32.mrf.mxu0  ;;  %v372_v53 = vpop.f32.mrf.mxu1 }
  0xcb   :  { %515 = vst.msk [vmem:[%s1131_s3 + $0x8] sm:$0xff] %vm513_vm2, %v472_v49  ;;  %v471_v54 = vmax.f32 %v263_v50, 0.0  ;;  %v494_v55 = vmax.f32 %v378_v51, 0.0  ;;  %v278_v56 = vadd.f32 %v657_v52, %v916_v44  ;;  %v373_v57 = vadd.f32 %v916_v44, %v372_v53 }
  0xcc   :  { %v272_v58 = vpop.f32.mrf.mxu0  ;;  %v690_v59 = vpop.f32.mrf.mxu1 }
  0xcd   :  { %514 = vst.msk [vmem:[%s1131_s3] sm:$0xff] %vm513_vm2, %v471_v54  ;;  %537 = vst.msk [vmem:[%s1131_s3 + $0xb8] sm:$0xff] %vm513_vm2, %v494_v55  ;;  %v474_v60 = vmax.f32 %v278_v56, 0.0  ;;  %v493_v61 = vmax.f32 %v373_v57, 0.0  ;;  %v273_v62 = vadd.f32 %v916_v44, %v272_v58  ;;  %v388_v63 = vadd.f32 %v690_v59, %v916_v44 }
  0xce   :  { %v660_v0 = vpop.f32.mrf.mxu0  ;;  %v382_v1 = vpop.f32.mrf.mxu1 }
  0xcf   :  { %517 = vst.msk [vmem:[%s1131_s3 + $0x18] sm:$0xff] %vm513_vm2, %v474_v60  ;;  %536 = vst.msk [vmem:[%s1131_s3 + $0xb0] sm:$0xff] %vm513_vm2, %v493_v61  ;;  %v473_v2 = vmax.f32 %v273_v62, 0.0  ;;  %v496_v3 = vmax.f32 %v388_v63, 0.0  ;;  %v288_v4 = vadd.f32 %v660_v0, %v916_v44  ;;  %v383_v5 = vadd.f32 %v916_v44, %v382_v1 }
  0xd0   :  { %v282_v6 = vpop.f32.mrf.mxu0  ;;  %v693_v7 = vpop.f32.mrf.mxu1 }
  0xd1   :  { %516 = vst.msk [vmem:[%s1131_s3 + $0x10] sm:$0xff] %vm513_vm2, %v473_v2  ;;  %539 = vst.msk [vmem:[%s1131_s3 + $0xc8] sm:$0xff] %vm513_vm2, %v496_v3  ;;  %v476_v8 = vmax.f32 %v288_v4, 0.0  ;;  %v495_v9 = vmax.f32 %v383_v5, 0.0  ;;  %v283_v10 = vadd.f32 %v916_v44, %v282_v6  ;;  %v398_v11 = vadd.f32 %v693_v7, %v916_v44 }
  0xd2   :  { %v663_v12 = vpop.f32.mrf.mxu0  ;;  %v392_v13 = vpop.f32.mrf.mxu1 }
  0xd3   :  { %519 = vst.msk [vmem:[%s1131_s3 + $0x28] sm:$0xff] %vm513_vm2, %v476_v8  ;;  %538 = vst.msk [vmem:[%s1131_s3 + $0xc0] sm:$0xff] %vm513_vm2, %v495_v9  ;;  %v475_v14 = vmax.f32 %v283_v10, 0.0  ;;  %v498_v15 = vmax.f32 %v398_v11, 0.0  ;;  %v298_v16 = vadd.f32 %v663_v12, %v916_v44  ;;  %v393_v17 = vadd.f32 %v916_v44, %v392_v13 }
  0xd4   :  { %v292_v18 = vpop.f32.mrf.mxu0  ;;  %v696_v19 = vpop.f32.mrf.mxu1 }
  0xd5   :  { %518 = vst.msk [vmem:[%s1131_s3 + $0x20] sm:$0xff] %vm513_vm2, %v475_v14  ;;  %541 = vst.msk [vmem:[%s1131_s3 + $0xd8] sm:$0xff] %vm513_vm2, %v498_v15  ;;  %v478_v20 = vmax.f32 %v298_v16, 0.0  ;;  %v497_v21 = vmax.f32 %v393_v17, 0.0  ;;  %v293_v22 = vadd.f32 %v916_v44, %v292_v18  ;;  %v408_v23 = vadd.f32 %v696_v19, %v916_v44 }
  0xd6   :  { %v666_v24 = vpop.f32.mrf.mxu0  ;;  %v402_v25 = vpop.f32.mrf.mxu1 }
  0xd7   :  { %521 = vst.msk [vmem:[%s1131_s3 + $0x38] sm:$0xff] %vm513_vm2, %v478_v20  ;;  %540 = vst.msk [vmem:[%s1131_s3 + $0xd0] sm:$0xff] %vm513_vm2, %v497_v21  ;;  %v477_v26 = vmax.f32 %v293_v22, 0.0  ;;  %v500_v27 = vmax.f32 %v408_v23, 0.0  ;;  %v308_v28 = vadd.f32 %v666_v24, %v916_v44  ;;  %v403_v29 = vadd.f32 %v916_v44, %v402_v25 }
  0xd8   :  { %v302_v30 = vpop.f32.mrf.mxu0  ;;  %v699_v31 = vpop.f32.mrf.mxu1 }
  0xd9   :  { %520 = vst.msk [vmem:[%s1131_s3 + $0x30] sm:$0xff] %vm513_vm2, %v477_v26  ;;  %543 = vst.msk [vmem:[%s1131_s3 + $0xe8] sm:$0xff] %vm513_vm2, %v500_v27  ;;  %v480_v32 = vmax.f32 %v308_v28, 0.0  ;;  %v499_v33 = vmax.f32 %v403_v29, 0.0  ;;  %v303_v34 = vadd.f32 %v916_v44, %v302_v30  ;;  %v418_v35 = vadd.f32 %v699_v31, %v916_v44 }
  0xda   :  { %v669_v36 = vpop.f32.mrf.mxu0  ;;  %v412_v37 = vpop.f32.mrf.mxu1 }
  0xdb   :  { %523 = vst.msk [vmem:[%s1131_s3 + $0x48] sm:$0xff] %vm513_vm2, %v480_v32  ;;  %542 = vst.msk [vmem:[%s1131_s3 + $0xe0] sm:$0xff] %vm513_vm2, %v499_v33  ;;  %v479_v38 = vmax.f32 %v303_v34, 0.0  ;;  %v502_v39 = vmax.f32 %v418_v35, 0.0  ;;  %v318_v40 = vadd.f32 %v669_v36, %v916_v44  ;;  %v413_v41 = vadd.f32 %v916_v44, %v412_v37 }
  0xdc   :  { %v312_v42 = vpop.f32.mrf.mxu0  ;;  %v702_v43 = vpop.f32.mrf.mxu1 }
  0xdd   :  { %522 = vst.msk [vmem:[%s1131_s3 + $0x40] sm:$0xff] %vm513_vm2, %v479_v38  ;;  %545 = vst.msk [vmem:[%s1131_s3 + $0xf8] sm:$0xff] %vm513_vm2, %v502_v39  ;;  %v482_v45 = vmax.f32 %v318_v40, 0.0  ;;  %v501_v46 = vmax.f32 %v413_v41, 0.0  ;;  %v313_v47 = vadd.f32 %v916_v44, %v312_v42  ;;  %v428_v48 = vadd.f32 %v702_v43, %v916_v44 }
  0xde   :  { %v672_v49 = vpop.f32.mrf.mxu0  ;;  %v422_v50 = vpop.f32.mrf.mxu1 }
  0xdf   :  { %525 = vst.msk [vmem:[%s1131_s3 + $0x58] sm:$0xff] %vm513_vm2, %v482_v45  ;;  %544 = vst.msk [vmem:[%s1131_s3 + $0xf0] sm:$0xff] %vm513_vm2, %v501_v46  ;;  %v481_v51 = vmax.f32 %v313_v47, 0.0  ;;  %v504_v52 = vmax.f32 %v428_v48, 0.0  ;;  %v328_v53 = vadd.f32 %v672_v49, %v916_v44  ;;  %v423_v54 = vadd.f32 %v916_v44, %v422_v50 }
  0xe0   :  { %v322_v55 = vpop.f32.mrf.mxu0  ;;  %v705_v56 = vpop.f32.mrf.mxu1 }
  0xe1   :  { %524 = vst.msk [vmem:[%s1131_s3 + $0x50] sm:$0xff] %vm513_vm2, %v481_v51  ;;  %547 = vst.msk [vmem:[%s1131_s3 + $0x108] sm:$0xff] %vm513_vm2, %v504_v52  ;;  %v484_v57 = vmax.f32 %v328_v53, 0.0  ;;  %v503_v58 = vmax.f32 %v423_v54, 0.0  ;;  %v323_v59 = vadd.f32 %v916_v44, %v322_v55  ;;  %v438_v60 = vadd.f32 %v705_v56, %v916_v44 }
  0xe2   :  { %v675_v61 = vpop.f32.mrf.mxu0  ;;  %v432_v62 = vpop.f32.mrf.mxu1 }
  0xe3   :  { %527 = vst.msk [vmem:[%s1131_s3 + $0x68] sm:$0xff] %vm513_vm2, %v484_v57  ;;  %546 = vst.msk [vmem:[%s1131_s3 + $0x100] sm:$0xff] %vm513_vm2, %v503_v58  ;;  %v483_v63 = vmax.f32 %v323_v59, 0.0  ;;  %v506_v0 = vmax.f32 %v438_v60, 0.0  ;;  %v338_v1 = vadd.f32 %v675_v61, %v916_v44  ;;  %v433_v2 = vadd.f32 %v916_v44, %v432_v62 }
  0xe4   :  { %v332_v3 = vpop.f32.mrf.mxu0  ;;  %v708_v4 = vpop.f32.mrf.mxu1 }
  0xe5   :  { %526 = vst.msk [vmem:[%s1131_s3 + $0x60] sm:$0xff] %vm513_vm2, %v483_v63  ;;  %549 = vst.msk [vmem:[%s1131_s3 + $0x118] sm:$0xff] %vm513_vm2, %v506_v0  ;;  %v486_v5 = vmax.f32 %v338_v1, 0.0  ;;  %v505_v6 = vmax.f32 %v433_v2, 0.0  ;;  %v333_v7 = vadd.f32 %v916_v44, %v332_v3  ;;  %v448_v8 = vadd.f32 %v708_v4, %v916_v44 }
  0xe6   :  { %v678_v9 = vpop.f32.mrf.mxu0  ;;  %v442_v10 = vpop.f32.mrf.mxu1 }
  0xe7   :  { %529 = vst.msk [vmem:[%s1131_s3 + $0x78] sm:$0xff] %vm513_vm2, %v486_v5  ;;  %548 = vst.msk [vmem:[%s1131_s3 + $0x110] sm:$0xff] %vm513_vm2, %v505_v6  ;;  %v485_v11 = vmax.f32 %v333_v7, 0.0  ;;  %v508_v12 = vmax.f32 %v448_v8, 0.0  ;;  %v348_v13 = vadd.f32 %v678_v9, %v916_v44  ;;  %v443_v14 = vadd.f32 %v916_v44, %v442_v10 }
  0xe8   :  { %v342_v15 = vpop.f32.mrf.mxu0  ;;  %v711_v16 = vpop.f32.mrf.mxu1 }
  0xe9   :  { %528 = vst.msk [vmem:[%s1131_s3 + $0x70] sm:$0xff] %vm513_vm2, %v485_v11  ;;  %551 = vst.msk [vmem:[%s1131_s3 + $0x128] sm:$0xff] %vm513_vm2, %v508_v12  ;;  %v488_v17 = vmax.f32 %v348_v13, 0.0  ;;  %v507_v18 = vmax.f32 %v443_v14, 0.0  ;;  %v343_v19 = vadd.f32 %v916_v44, %v342_v15  ;;  %v458_v20 = vadd.f32 %v711_v16, %v916_v44 }
  0xea   :  { %v681_v21 = vpop.f32.mrf.mxu0  ;;  %v452_v22 = vpop.f32.mrf.mxu1 }
  0xeb   :  { %531 = vst.msk [vmem:[%s1131_s3 + $0x88] sm:$0xff] %vm513_vm2, %v488_v17  ;;  %550 = vst.msk [vmem:[%s1131_s3 + $0x120] sm:$0xff] %vm513_vm2, %v507_v18  ;;  %v487_v23 = vmax.f32 %v343_v19, 0.0  ;;  %v510_v24 = vmax.f32 %v458_v20, 0.0  ;;  %v358_v25 = vadd.f32 %v681_v21, %v916_v44  ;;  %v453_v26 = vadd.f32 %v916_v44, %v452_v22 }
  0xec   :  { %v352_v27 = vpop.f32.mrf.mxu0  ;;  %v714_v28 = vpop.f32.mrf.mxu1 }
  0xed   :  { %530 = vst.msk [vmem:[%s1131_s3 + $0x80] sm:$0xff] %vm513_vm2, %v487_v23  ;;  %553 = vst.msk [vmem:[%s1131_s3 + $0x138] sm:$0xff] %vm513_vm2, %v510_v24  ;;  %v490_v29 = vmax.f32 %v358_v25, 0.0  ;;  %v509_v30 = vmax.f32 %v453_v26, 0.0  ;;  %v353_v31 = vadd.f32 %v916_v44, %v352_v27  ;;  %v468_v32 = vadd.f32 %v714_v28, %v916_v44 }
  0xee   :  { %v684_v33 = vpop.f32.mrf.mxu0  ;;  %v462_v34 = vpop.f32.mrf.mxu1 }
  0xef   :  { %533 = vst.msk [vmem:[%s1131_s3 + $0x98] sm:$0xff] %vm513_vm2, %v490_v29  ;;  %552 = vst.msk [vmem:[%s1131_s3 + $0x130] sm:$0xff] %vm513_vm2, %v509_v30  ;;  %v489_v35 = vmax.f32 %v353_v31, 0.0  ;;  %v512_v36 = vmax.f32 %v468_v32, 0.0  ;;  %v368_v37 = vadd.f32 %v684_v33, %v916_v44  ;;  %v463_v38 = vadd.f32 %v916_v44, %v462_v34 }
  0xf0   :  { %v362_v39 = vpop.f32.mrf.mxu0 }
  0xf1   :  { %532 = vst.msk [vmem:[%s1131_s3 + $0x90] sm:$0xff] %vm513_vm2, %v489_v35  ;;  %555 = vst.msk [vmem:[%s1131_s3 + $0x148] sm:$0xff] %vm513_vm2, %v512_v36  ;;  %v492_v40 = vmax.f32 %v368_v37, 0.0  ;;  %v511_v41 = vmax.f32 %v463_v38, 0.0  ;;  %v363_v42 = vadd.f32 %v916_v44, %v362_v39 }
  0xf3   :  { %535 = vst.msk [vmem:[%s1131_s3 + $0xa8] sm:$0xff] %vm513_vm2, %v492_v40  ;;  %554 = vst.msk [vmem:[%s1131_s3 + $0x140] sm:$0xff] %vm513_vm2, %v511_v41  ;;  %v491_v43 = vmax.f32 %v363_v42, 0.0 }
  0xf5   :  { %534 = vst.msk [vmem:[%s1131_s3 + $0xa0] sm:$0xff] %vm513_vm2, %v491_v43 }

</bundles_post_ra>
